<compile_context>
chip_gen: v6e
topology: v6e:2x2x1
jax: 0.10.0
libtpu: 0.0.40
codegen_flags: <defaults>
</compile_context>

<pallas_src>
import functools
import math

import jax
import jax.numpy as jnp
import numpy as np
from jax.experimental import pallas as pl
from jax.experimental.pallas import tpu as pltpu

_LOG2PI = float(math.log(2.0 * math.pi))


def _round_up(a, m):
    return (a + m - 1) // m * m


def _nf_forward_kernel(x_ref, mu_ref, invvar_ref, const_ref, w_ref, s_ref,
                       gt_ref, gdiag_ref, b_ref,
                       xout_ref, stats_ref, *, flow_length):
    f32 = jnp.float32
    x = x_ref[...]                       # (TB, D)
    mu = mu_ref[...]                     # (1, D)
    inv_var = invvar_ref[...]            # (1, D) = exp(-log_var)

    # ---- base-dist log prob as a lane-dense (1, TB) row ---------------------
    # -0.5 * sum_d (x - mu)^2 / var + const ; the D-reduction runs on the MXU.
    t = x - mu
    q = jax.lax.dot_general(
        inv_var, t * t,
        dimension_numbers=(((1,), (1,)), ((), ())),
        preferred_element_type=f32)                       # (1, TB)
    logp = -0.5 * q + const_ref[...]                      # (1, TB) + (1, 1)

    # ---- planar-flow chain on the transposed (L, TB) buffer -----------------
    w = w_ref[...]                       # (L, D)
    s = s_ref[...]                       # (L, D)
    gt = gt_ref[...]                     # (L, L): gt[j, i] = w_j.s_i for j>i, else 0
    gdiag = gdiag_ref[...]               # (L, 1): w_i.s_i
    b = b_ref[...]                       # (L, 1)

    # p[j, :] starts as w_j.x0 + b_j ; step i adds act_i * (s_i.w_j) to rows
    # j > i, so row i always holds the exact pre-activation of flow i when read.
    p = jax.lax.dot_general(
        w, x, dimension_numbers=(((1,), (1,)), ((), ())),
        preferred_element_type=f32) + b                   # (L, TB) = W @ x^T + b

    # Static unroll: L is tiny and the live working set stays at
    # ~L*ceil(TB/128) vregs in this layout.
    # TODO(synk): switch to lax.fori_loop(..., unroll=True) on this transposed
    # buffer if flow_length ever grows beyond ~16.
    for i in range(flow_length - 1):
        act_i = jnp.tanh(p[i:i + 1, :])                   # (1, TB) lane-dense
        p = p + gt[:, i:i + 1] * act_i                    # only rows j > i change

    a = jnp.tanh(p)                                       # (L, TB): row i == act_i

    # det_grad_i = 1 + (1 - act_i^2) * <w_i, s_i> ; logdet = sum_i log(|.| + eps)
    det = 1.0 + (1.0 - a * a) * gdiag                     # (L, TB)
    logdet = jnp.sum(jnp.log(jnp.abs(det) + 1e-7),
                     axis=0, keepdims=True)               # (1, TB)

    stats_ref[0:1, :] = logp
    stats_ref[1:2, :] = logdet

    # x_out = x0 + sum_i act_i * s_i = x0 + A^T @ S  (MXU, contract the L axis)
    xout_ref[...] = x + jax.lax.dot_general(
        a, s, dimension_numbers=(((0,), (0,)), ((), ())),
        preferred_element_type=f32)                       # (TB, D)


def _pick_tile_b(B, D):
    # Per grid step (double-buffered): 2 bufs * (x_in + x_out) * tile_b*D*4B;
    # params/stats are negligible.  An 8 MiB budget stays far under the 32 MiB
    # default scoped-VMEM limit on v5e/v6e/v7x.
    budget = 8 << 20
    per_row = 2 * 2 * D * 4
    tb = min(2048, max(128, budget // max(per_row, 1)))
    tb = min(tb, _round_up(B, 128))                 # don't tile past the batch
    if B > 256:                                     # >=2 grid steps -> v7x megacore
        tb = min(tb, _round_up(-(-B // 2), 128))
    return max(128, _round_up(tb, 128))


def normalizing_flows_forward(x, mu, log_var, weight, bias, scale, *, tile_b=None):
    """Forward pass of NormalizingFlows.

    x: (B, D); mu/log_var: (D,); weight/scale: (L, D); bias: (L,).
    Returns (x_transformed (B, D), log_prob_base_dist (B,), log_det (B,)).
    """
    f32 = jnp.float32
    B, D = x.shape
    L = weight.shape[0]

    if tile_b is None:
        tile_b = _pick_tile_b(B, D)
    tile_b = max(128, _round_up(tile_b, 128))       # lane-dense stats blocks
    Bp = _round_up(B, tile_b)
    nb = Bp // tile_b

    # ---- wrapper-side precompute (tiny XLA ops, off the kernel's path) ------
    w32 = weight.astype(f32)
    s32 = scale.astype(f32)
    lv32 = log_var.astype(f32)

    x32 = x.astype(f32)
    x_p = x32 if Bp == B else jnp.zeros((Bp, D), f32).at[:B].set(x32)
    mu_row = mu.astype(f32).reshape(1, D)
    invvar_row = jnp.exp(-lv32).reshape(1, D)
    const = jnp.sum(-0.5 * lv32 - 0.5 * _LOG2PI).reshape(1, 1)      # (1, 1)
    gt = jnp.tril(w32 @ s32.T, -1)                                  # (L, L) strict lower
    gdiag_col = jnp.sum(w32 * s32, axis=1).reshape(L, 1)            # (L, 1)
    b_col = bias.astype(f32).reshape(L, 1)                          # (L, 1)

    kernel = functools.partial(_nf_forward_kernel, flow_length=L)
    rep = lambda b: (0, 0)                                          # replicated params

    out_shapes = (
        jax.ShapeDtypeStruct((Bp, D), f32),   # transformed x (row-padded only)
        jax.ShapeDtypeStruct((2, Bp), f32),   # [logp; logdet] lane-dense slab
    )

    xo, stats = pl.pallas_call(
        kernel,
        out_shape=out_shapes,
        grid=(nb,),
        in_specs=[
            pl.BlockSpec((tile_b, D), lambda b: (b, 0)),   # x
            pl.BlockSpec((1, D), rep),                     # mu
            pl.BlockSpec((1, D), rep),                     # exp(-log_var)
            pl.BlockSpec((1, 1), rep),                     # logp constant
            pl.BlockSpec((L, D), rep),                     # W
            pl.BlockSpec((L, D), rep),                     # S
            pl.BlockSpec((L, L), rep),                     # strict-lower Gram W S^T
            pl.BlockSpec((L, 1), rep),                     # diag(W S^T)
            pl.BlockSpec((L, 1), rep),                     # bias column
        ],
        out_specs=(
            pl.BlockSpec((tile_b, D), lambda b: (b, 0)),
            pl.BlockSpec((2, tile_b), lambda b: (0, b)),
        ),
        compiler_params=pltpu.CompilerParams(
            dimension_semantics=("parallel",)),            # 2 TCs on v7x
    )(x_p, mu_row, invvar_row, const, w32, s32, gt, gdiag_col, b_col)

    return xo[:B], stats[0, :B], stats[1, :B]


def _reference_forward(x, mu, log_var, weight, bias, scale):
    """Pure-JAX reference mirroring the PyTorch module."""
    std = jnp.exp(0.5 * log_var)
    lp = (-0.5 * ((x - mu) / std) ** 2
          - jnp.log(std) - 0.5 * jnp.log(2.0 * jnp.pi)).sum(axis=-1)
    logdet = jnp.zeros(x.shape[0])
    for i in range(weight.shape[0]):
        w = weight[i:i + 1]      # (1, D)
        s = scale[i:i + 1]       # (1, D)
        act = jnp.tanh(x @ w.T + bias[i])       # (B, 1)
        x = x + s * act
        psi = (1.0 - act ** 2) * w              # (B, D)
        det_grad = 1.0 + psi @ s.T              # (B, 1)
        logdet = logdet + jnp.log(jnp.abs(det_grad) + 1e-7)[:, 0]
    return x, lp, logdet


if __name__ == "__main__":
    # Non-tile-multiple batch exercises row padding; default tile picker gives
    # a 2-step "parallel" grid (tile_b=256, Bp=512) -> pipelining + megacore.
    B, D, L = 300, 32, 4
    key = jax.random.PRNGKey(0)
    kx, kmu, klv, kw, kb, ks = jax.random.split(key, 6)

    x = jax.random.normal(kx, (B, D), dtype=jnp.float32)
    # parameters initialized like the module: uniform(-0.01, 0.01)
    mu = jax.random.uniform(kmu, (D,), minval=-0.01, maxval=0.01)
    log_var = jax.random.uniform(klv, (D,), minval=-0.01, maxval=0.01)
    weight = jax.random.uniform(kw, (L, D), minval=-0.01, maxval=0.01)
    bias = jax.random.uniform(kb, (L,), minval=-0.01, maxval=0.01)
    scale = jax.random.uniform(ks, (L, D), minval=-0.01, maxval=0.01)

    xo, logp, logdet = normalizing_flows_forward(x, mu, log_var, weight, bias, scale)
    jax.block_until_ready((xo, logp, logdet))

    xr, lpr, ldr = _reference_forward(x, mu, log_var, weight, bias, scale)
    assert np.allclose(np.asarray(xo), np.asarray(xr), atol=1e-5)
    assert np.allclose(np.asarray(logp), np.asarray(lpr), atol=1e-4)
    assert np.allclose(np.asarray(logdet), np.asarray(ldr), atol=1e-5)

    print("KERNEL_OK")
</pallas_src>

<mosaic_0001>
module attributes {stable_mosaic.version = 11 : i64} {
  func.func @_nf_forward_kernel(%arg0: i32, %arg1: memref<256x32xf32, #tpu.memory_space<vmem>>, %arg2: memref<1x32xf32, #tpu.memory_space<vmem>>, %arg3: memref<1x32xf32, #tpu.memory_space<vmem>>, %arg4: memref<1x1xf32, #tpu.memory_space<vmem>>, %arg5: memref<4x32xf32, #tpu.memory_space<vmem>>, %arg6: memref<4x32xf32, #tpu.memory_space<vmem>>, %arg7: memref<4x4xf32, #tpu.memory_space<vmem>>, %arg8: memref<4x1xf32, #tpu.memory_space<vmem>>, %arg9: memref<4x1xf32, #tpu.memory_space<vmem>>, %arg10: memref<256x32xf32, #tpu.memory_space<vmem>>, %arg11: memref<2x256xf32, #tpu.memory_space<vmem>>) attributes {dimension_semantics = [#tpu.dimension_semantics<parallel>], iteration_bounds = array<i64: 2>, scalar_prefetch = 0 : i64, scratch_operands = 0 : i64, tpu.core_type = #tpu.core_type<tc>, window_params = [{transform_indices = @transform_0, window_bounds = array<i64: 256, 32>}, {pipeline_mode = #tpu.pipeline_mode<synchronous>, transform_indices = @transform_1, window_bounds = array<i64: 1, 32>}, {pipeline_mode = #tpu.pipeline_mode<synchronous>, transform_indices = @transform_2, window_bounds = array<i64: 1, 32>}, {pipeline_mode = #tpu.pipeline_mode<synchronous>, transform_indices = @transform_3, window_bounds = array<i64: 1, 1>}, {pipeline_mode = #tpu.pipeline_mode<synchronous>, transform_indices = @transform_4, window_bounds = array<i64: 4, 32>}, {pipeline_mode = #tpu.pipeline_mode<synchronous>, transform_indices = @transform_5, window_bounds = array<i64: 4, 32>}, {pipeline_mode = #tpu.pipeline_mode<synchronous>, transform_indices = @transform_6, window_bounds = array<i64: 4, 4>}, {pipeline_mode = #tpu.pipeline_mode<synchronous>, transform_indices = @transform_7, window_bounds = array<i64: 4, 1>}, {pipeline_mode = #tpu.pipeline_mode<synchronous>, transform_indices = @transform_8, window_bounds = array<i64: 4, 1>}, {transform_indices = @transform_9, window_bounds = array<i64: 256, 32>}, {transform_indices = @transform_10, window_bounds = array<i64: 2, 256>}]} {
    %c0 = arith.constant 0 : index
    %c0_0 = arith.constant 0 : index
    %0 = vector.load %arg1[%c0, %c0_0] : memref<256x32xf32, #tpu.memory_space<vmem>>, vector<256x32xf32>
    %c0_1 = arith.constant 0 : index
    %c0_2 = arith.constant 0 : index
    %1 = vector.load %arg2[%c0_1, %c0_2] : memref<1x32xf32, #tpu.memory_space<vmem>>, vector<1x32xf32>
    %c0_3 = arith.constant 0 : index
    %c0_4 = arith.constant 0 : index
    %2 = vector.load %arg3[%c0_3, %c0_4] : memref<1x32xf32, #tpu.memory_space<vmem>>, vector<1x32xf32>
    %3 = vector.broadcast %1 : vector<1x32xf32> to vector<256x32xf32>
    %4 = arith.subf %0, %3 : vector<256x32xf32>
    %5 = arith.mulf %4, %4 : vector<256x32xf32>
    %cst = arith.constant dense<0.000000e+00> : vector<1x256xf32>
    %6 = tpu.matmul %2, %5, %cst {dimension_numbers = #tpu.dot_dimension_numbers<[1], [1], [0], [0], [0, 0, 1, 0], [], []>} : vector<1x32xf32>, vector<256x32xf32>, vector<1x256xf32> -> vector<1x256xf32>
    %cst_5 = arith.constant -5.000000e-01 : f32
    %7 = vector.broadcast %cst_5 : f32 to vector<1x256xf32>
    %8 = arith.mulf %7, %6 : vector<1x256xf32>
    %c0_6 = arith.constant 0 : index
    %c0_7 = arith.constant 0 : index
    %9 = vector.load %arg4[%c0_6, %c0_7] : memref<1x1xf32, #tpu.memory_space<vmem>>, vector<1x1xf32>
    %10 = vector.broadcast %9 : vector<1x1xf32> to vector<1x256xf32>
    %11 = arith.addf %8, %10 : vector<1x256xf32>
    %c0_8 = arith.constant 0 : index
    %c0_9 = arith.constant 0 : index
    %12 = vector.load %arg5[%c0_8, %c0_9] : memref<4x32xf32, #tpu.memory_space<vmem>>, vector<4x32xf32>
    %c0_10 = arith.constant 0 : index
    %c0_11 = arith.constant 0 : index
    %13 = vector.load %arg6[%c0_10, %c0_11] : memref<4x32xf32, #tpu.memory_space<vmem>>, vector<4x32xf32>
    %c0_12 = arith.constant 0 : index
    %c0_13 = arith.constant 0 : index
    %14 = vector.load %arg7[%c0_12, %c0_13] : memref<4x4xf32, #tpu.memory_space<vmem>>, vector<4x4xf32>
    %c0_14 = arith.constant 0 : index
    %c0_15 = arith.constant 0 : index
    %15 = vector.load %arg8[%c0_14, %c0_15] : memref<4x1xf32, #tpu.memory_space<vmem>>, vector<4x1xf32>
    %c0_16 = arith.constant 0 : index
    %c0_17 = arith.constant 0 : index
    %16 = vector.load %arg9[%c0_16, %c0_17] : memref<4x1xf32, #tpu.memory_space<vmem>>, vector<4x1xf32>
    %cst_18 = arith.constant dense<0.000000e+00> : vector<4x256xf32>
    %17 = tpu.matmul %12, %0, %cst_18 {dimension_numbers = #tpu.dot_dimension_numbers<[1], [1], [0], [0], [0, 0, 1, 0], [], []>} : vector<4x32xf32>, vector<256x32xf32>, vector<4x256xf32> -> vector<4x256xf32>
    %18 = vector.broadcast %16 : vector<4x1xf32> to vector<4x256xf32>
    %19 = arith.addf %17, %18 : vector<4x256xf32>
    %20 = vector.extract_strided_slice %19 {offsets = [0, 0], sizes = [1, 256], strides = [1, 1]} : vector<4x256xf32> to vector<1x256xf32>
    %21 = math.tanh %20 : vector<1x256xf32>
    %22 = vector.extract_strided_slice %14 {offsets = [0, 0], sizes = [4, 1], strides = [1, 1]} : vector<4x4xf32> to vector<4x1xf32>
    %23 = vector.broadcast %22 : vector<4x1xf32> to vector<4x256xf32>
    %24 = vector.broadcast %21 : vector<1x256xf32> to vector<4x256xf32>
    %25 = arith.mulf %23, %24 : vector<4x256xf32>
    %26 = arith.addf %19, %25 : vector<4x256xf32>
    %27 = vector.extract_strided_slice %26 {offsets = [1, 0], sizes = [1, 256], strides = [1, 1]} : vector<4x256xf32> to vector<1x256xf32>
    %28 = math.tanh %27 : vector<1x256xf32>
    %29 = vector.extract_strided_slice %14 {offsets = [0, 1], sizes = [4, 1], strides = [1, 1]} : vector<4x4xf32> to vector<4x1xf32>
    %30 = vector.broadcast %29 : vector<4x1xf32> to vector<4x256xf32>
    %31 = vector.broadcast %28 : vector<1x256xf32> to vector<4x256xf32>
    %32 = arith.mulf %30, %31 : vector<4x256xf32>
    %33 = arith.addf %26, %32 : vector<4x256xf32>
    %34 = vector.extract_strided_slice %33 {offsets = [2, 0], sizes = [1, 256], strides = [1, 1]} : vector<4x256xf32> to vector<1x256xf32>
    %35 = math.tanh %34 : vector<1x256xf32>
    %36 = vector.extract_strided_slice %14 {offsets = [0, 2], sizes = [4, 1], strides = [1, 1]} : vector<4x4xf32> to vector<4x1xf32>
    %37 = vector.broadcast %36 : vector<4x1xf32> to vector<4x256xf32>
    %38 = vector.broadcast %35 : vector<1x256xf32> to vector<4x256xf32>
    %39 = arith.mulf %37, %38 : vector<4x256xf32>
    %40 = arith.addf %33, %39 : vector<4x256xf32>
    %41 = math.tanh %40 : vector<4x256xf32>
    %42 = arith.mulf %41, %41 : vector<4x256xf32>
    %cst_19 = arith.constant 1.000000e+00 : f32
    %43 = vector.broadcast %cst_19 : f32 to vector<4x256xf32>
    %44 = arith.subf %43, %42 : vector<4x256xf32>
    %45 = vector.broadcast %15 : vector<4x1xf32> to vector<4x256xf32>
    %46 = arith.mulf %44, %45 : vector<4x256xf32>
    %cst_20 = arith.constant 1.000000e+00 : f32
    %47 = vector.broadcast %cst_20 : f32 to vector<4x256xf32>
    %48 = arith.addf %47, %46 : vector<4x256xf32>
    %49 = math.absf %48 : vector<4x256xf32>
    %cst_21 = arith.constant 1.000000e-07 : f32
    %50 = vector.broadcast %cst_21 : f32 to vector<4x256xf32>
    %51 = arith.addf %49, %50 : vector<4x256xf32>
    %52 = math.log %51 : vector<4x256xf32>
    %cst_22 = arith.constant dense<0.000000e+00> : vector<256xf32>
    %53 = vector.multi_reduction <add>, %52, %cst_22 [0] : vector<4x256xf32> to vector<256xf32>
    %54 = vector.shape_cast %53 : vector<256xf32> to vector<1x256xf32>
    %c0_23 = arith.constant 0 : index
    %c0_24 = arith.constant 0 : index
    %55 = vector.load %arg11[%c0_23, %c0_24] : memref<2x256xf32, #tpu.memory_space<vmem>>, vector<1x256xf32>
    tpu.vector_store %arg11[%c0_23, %c0_24], %11 {strides = array<i32>} : memref<2x256xf32, #tpu.memory_space<vmem>>, vector<1x256xf32>,
    %c1 = arith.constant 1 : index
    %c0_25 = arith.constant 0 : index
    %56 = vector.load %arg11[%c1, %c0_25] : memref<2x256xf32, #tpu.memory_space<vmem>>, vector<1x256xf32>
    tpu.vector_store %arg11[%c1, %c0_25], %54 {strides = array<i32>} : memref<2x256xf32, #tpu.memory_space<vmem>>, vector<1x256xf32>,
    %cst_26 = arith.constant dense<0.000000e+00> : vector<256x32xf32>
    %57 = tpu.matmul %41, %13, %cst_26 {dimension_numbers = #tpu.dot_dimension_numbers<[0], [0], [1], [1], [0, 1, 1, 1], [], []>} : vector<4x256xf32>, vector<4x32xf32>, vector<256x32xf32> -> vector<256x32xf32>
    %58 = arith.addf %0, %57 : vector<256x32xf32>
    %c0_27 = arith.constant 0 : index
    %c0_28 = arith.constant 0 : index
    %59 = vector.load %arg10[%c0_27, %c0_28] : memref<256x32xf32, #tpu.memory_space<vmem>>, vector<256x32xf32>
    tpu.vector_store %arg10[%c0_27, %c0_28], %58 {strides = array<i32>} : memref<256x32xf32, #tpu.memory_space<vmem>>, vector<256x32xf32>,
    return
  }
  func.func @transform_0(%arg0: i32) -> (i32, i32) {
    %c0_i32 = arith.constant 0 : i32
    %c0_i32_0 = arith.constant 0 : i32
    return %arg0, %c0_i32 : i32, i32
  }
  func.func @transform_1(%arg0: i32) -> (i32, i32) {
    %c0_i32 = arith.constant 0 : i32
    %c0_i32_0 = arith.constant 0 : i32
    %c0_i32_1 = arith.constant 0 : i32
    return %c0_i32, %c0_i32_0 : i32, i32
  }
  func.func @transform_2(%arg0: i32) -> (i32, i32) {
    %c0_i32 = arith.constant 0 : i32
    %c0_i32_0 = arith.constant 0 : i32
    %c0_i32_1 = arith.constant 0 : i32
    return %c0_i32, %c0_i32_0 : i32, i32
  }
  func.func @transform_3(%arg0: i32) -> (i32, i32) {
    %c0_i32 = arith.constant 0 : i32
    %c0_i32_0 = arith.constant 0 : i32
    %c0_i32_1 = arith.constant 0 : i32
    return %c0_i32, %c0_i32_0 : i32, i32
  }
  func.func @transform_4(%arg0: i32) -> (i32, i32) {
    %c0_i32 = arith.constant 0 : i32
    %c0_i32_0 = arith.constant 0 : i32
    %c0_i32_1 = arith.constant 0 : i32
    return %c0_i32, %c0_i32_0 : i32, i32
  }
  func.func @transform_5(%arg0: i32) -> (i32, i32) {
    %c0_i32 = arith.constant 0 : i32
    %c0_i32_0 = arith.constant 0 : i32
    %c0_i32_1 = arith.constant 0 : i32
    return %c0_i32, %c0_i32_0 : i32, i32
  }
  func.func @transform_6(%arg0: i32) -> (i32, i32) {
    %c0_i32 = arith.constant 0 : i32
    %c0_i32_0 = arith.constant 0 : i32
    %c0_i32_1 = arith.constant 0 : i32
    return %c0_i32, %c0_i32_0 : i32, i32
  }
  func.func @transform_7(%arg0: i32) -> (i32, i32) {
    %c0_i32 = arith.constant 0 : i32
    %c0_i32_0 = arith.constant 0 : i32
    %c0_i32_1 = arith.constant 0 : i32
    return %c0_i32, %c0_i32_0 : i32, i32
  }
  func.func @transform_8(%arg0: i32) -> (i32, i32) {
    %c0_i32 = arith.constant 0 : i32
    %c0_i32_0 = arith.constant 0 : i32
    %c0_i32_1 = arith.constant 0 : i32
    return %c0_i32, %c0_i32_0 : i32, i32
  }
  func.func @transform_9(%arg0: i32) -> (i32, i32) {
    %c0_i32 = arith.constant 0 : i32
    %c0_i32_0 = arith.constant 0 : i32
    return %arg0, %c0_i32 : i32, i32
  }
  func.func @transform_10(%arg0: i32) -> (i32, i32) {
    %c0_i32 = arith.constant 0 : i32
    %c0_i32_0 = arith.constant 0 : i32
    return %c0_i32, %arg0 : i32, i32
  }
}

</mosaic_0001>

<bundles_post_ra>
// kernel: tpu_custom_call.1
= control target key start
LH: loop header
LB: loop body
LE: loop exit
PB: predicated region body
PF: predicated region fallthrough
CT: control target
= control target key end

     0   :  { %s2563_s0 = inlined_call_operand.vmem [shape: f32[512,32], index: 0, kind: input, shape index: {}]   ;;  %s2564_s1 = inlined_call_operand.vmem [shape: f32[1,32], index: 1, kind: input, shape index: {}]   ;;  %s2565_s2 = inlined_call_operand.vmem [shape: f32[1,32], index: 2, kind: input, shape index: {}]   ;;  %s2566_s3 = inlined_call_operand.<no memory space> [shape: f32[1,1], index: 3, kind: input, shape index: {}]   ;;  %s2567_s4 = inlined_call_operand.vmem [shape: f32[4,32], index: 4, kind: input, shape index: {}]   ;;  %s2568_s5 = inlined_call_operand.vmem [shape: f32[4,32], index: 5, kind: input, shape index: {}]   ;;  %s2569_s6 = inlined_call_operand.vmem [shape: f32[4,4], index: 6, kind: input, shape index: {}]   ;;  %s2570_s7 = inlined_call_operand.vmem [shape: f32[4,1], index: 7, kind: input, shape index: {}]   ;;  %s2571_s8 = inlined_call_operand.vmem [shape: f32[4,1], index: 8, kind: input, shape index: {}]   ;;  %s2572_s9 = inlined_call_operand.vmem [shape: f32[512,32], index: 9, kind: output, shape index: {0}]   ;;  %s2573_s10 = inlined_call_operand.hbm [shape: f32[2,512], index: 10, kind: output, shape index: {1}]  }
   0x1   :  { %2575 = sst [smem:[#allocation6_spill]] %s2563_s0  ;;  %v16_v0 = vstv %s2566_s3 }
   0x2   :  { %17 = vst [vmem:[#allocation2] sm:$0x1] %v16_v0 }
   0x3   :  { %18 = vsyncpa [#allocation4], 0 }
   0x4   :  { %20 = vsyncpa [#allocation4 + $0x1], 0  ;;  %s2005_s15 = smov 0   ;;  %s2007_s16 = smov 0  }
   0x5   :  { %s2009_s17 = smov 0   ;;  %s2011_s18 = smov 0  }
   0x6 LB: > { %s2026_s3 = sadd.s32 4294967295, %s1940_s18   ;;  %s1543_s19 = sadd.s32 4294967294, %s1940_s18   ;;  %s1940_s18 = sphi %s2011_s18, %s2585_s18   ;;  %s1936_s17 = sphi %s2009_s17, %s2584_s17   ;;  %s1932_s16 = sphi %s2007_s16, %s2583_s16   ;;  %s1928_s15 = sphi %s2005_s15, %s2582_s15  }
   0x7   : > { %s2030_s20 = sadd.s32 1, %s1940_s18   ;;  %s253_s21 = sadd.s32 1, %s1936_s17 }
   0x8   : > { %s250_s22 = ssub.s32 %s1940_s18, %s2030_s20  ;;  %p263_p0 = scmp.ne.s32.totalorder %s1936_s17, %s1932_s16 }
   0x9   : > { %p251_p1 = scmp.eq.s32.totalorder %s250_s22, 0  ;;  %p264_p2 = scmp.eq.s32.totalorder %s2026_s3, 1 }
   0xa   : > { %p269_p3 = scmp.ne.s32.totalorder %s1932_s16, %s1928_s15  ;;  %p270_p4 = scmp.eq.s32.totalorder %s1543_s19, 1 }
   0xb   : > { %s2041_s23 = scalar_select %p251_p1, %s1936_s17, %s253_s21  }
   0xc   : > { %p2043_p5 = por %p264_p2, %p263_p0  ;;  %p2047_p6 = por %p270_p4, %p269_p3 }
   0xd   : > { %p1546_p7 = scmp.ge.s32.totalorder %s1940_s18, 1  ;;  %p321_p8 = scmp.lt.s32.totalorder %s1940_s18, 3 }
   0xf   : > { %p322_p9 = pnand %p1546_p7, %p321_p8 }
  0x10   : > { %s1548_s26 = sshll.u32 (!%p322_p9), %s2026_s3, 5  ;;  %s2578_s0 = sld [smem:[#allocation6_spill]] (!%p322_p9) }
  0x11   : > { %325 = sbr.rel (%p322_p9) target bundleno = 744 (0x2e8), region = 56  ;;  %p365_p10 = scmp.lt.s32.totalorder (!%p322_p9), %s1548_s26, 63 }
  0x12   : > { %s361_s19 = sand.u32 (!%p322_p9), 1, %s1932_s16   ;;  %s1658_s27 = sshll.u32 (!%p322_p9), %s2026_s3, 6 }
  0x13   : > { %s1457_s11 = scalar_lea.hbm (!%p322_p9), %s2573_s10, %s1658_s27  ;;  %s1441_s12 = scalar_lea.sflag (!%p322_p9), [#allocation4], %s361_s19 }
  0x16   : > { %vm481_vm0 = vcmask 261120   ;;  %v2057_v1 = vld [vmem:[%s2567_s4] sm:$0xf]  ;;  %v1942_v3 = vmov 0   ;;  %s2587_s26 = smov (!%p365_p10, %s1548_s26), 63  ;;  %v1943_v5 = vmov 1  }
  0x17   : > { %1725 = vmatprep.mubr.msk.f32.mxu1 %vm481_vm0, %v2057_v1  ;;  %v670_v2 = vld [vmem:[%s2571_s8] sm:$0xf]  ;;  %1856 = vset.pattern.permute.xlu0 %v1942_v3  ;;  %s2574_s13 = sshll.u32 %s2587_s26, 3  ;;  %v1944_v9 = vmov 2   ;;  %vm924_vm1 = vcmask 1043456   ;;  %vm1046_vm2 = vcmask 31744  }
  0x18   : > { %673 = vperm.xlu0 %1856, %v670_v2   ;;  %v668_v4 = vld [vmem:[%s2569_s6] sm:$0xf]  ;;  %1857 = vset.pattern.permute.xlu1 %v1943_v5  ;;  %s2076_s21 = scalar_lea.vmem %s2578_s0, %s2574_s13 }
  0x19   : > { %868 = vperm.xlu1 %1857, %v668_v4   ;;  %v2079_v6 = vld [vmem:[%s2076_s21 + $0xf8] sm:$0xff]  ;;  %v2085_v8 = vld [vmem:[%s2076_s21 + $0xf0] sm:$0xff]  ;;  %v2097_v11 = vld [vmem:[%s2076_s21 + $0xe8] sm:$0xff] }
  0x1a   : > { %v2082_v7 = vld [vmem:[%s2076_s21 + $0x78] sm:$0xff]  ;;  %1693 = vmatprep.subr.msk.mxu1 %vm481_vm0, %v2079_v6  ;;  %v2094_v10 = vld [vmem:[%s2076_s21 + $0x70] sm:$0xff]  ;;  %v2104_v12 = vld [vmem:[%s2076_s21 + $0x68] sm:$0xff] }
  0x1b   : > { %1694 = vmatpush3.xpose.msk.msra.mxu1 %vm481_vm0, %v2082_v7  ;;  %v2107_v13 = vld [vmem:[%s2076_s21 + $0xe0] sm:$0xff]  ;;  %v2117_v15 = vld [vmem:[%s2076_s21 + $0xd8] sm:$0xff]  ;;  %v2127_v17 = vld [vmem:[%s2076_s21 + $0xd0] sm:$0xff] }
  0x1c   : > { %850 = vperm.xlu0 %1856, %v668_v4   ;;  %1695 = vmatprep.subr.msk.mxu1 %vm481_vm0, %v2085_v8  ;;  %v2114_v14 = vld [vmem:[%s2076_s21 + $0x60] sm:$0xff]  ;;  %v2124_v16 = vld [vmem:[%s2076_s21 + $0x58] sm:$0xff]  ;;  %v2134_v18 = vld [vmem:[%s2076_s21 + $0x50] sm:$0xff] }
  0x1d   : > { %1858 = vset.pattern.permute.xlu1 %v1944_v9  ;;  %v2137_v19 = vld [vmem:[%s2076_s21 + $0xc8] sm:$0xff]  ;;  %v2147_v21 = vld [vmem:[%s2076_s21 + $0xc0] sm:$0xff]  ;;  %v2157_v23 = vld [vmem:[%s2076_s21 + $0xb8] sm:$0xff] }
  0x1e   : > { %886 = vperm.xlu1 %1858, %v668_v4   ;;  %v2144_v20 = vld [vmem:[%s2076_s21 + $0x48] sm:$0xff]  ;;  %v2154_v22 = vld [vmem:[%s2076_s21 + $0x40] sm:$0xff]  ;;  %v2164_v24 = vld [vmem:[%s2076_s21 + $0x38] sm:$0xff] }
  0x1f   : > { %1696 = vmatpush3.xpose.msk.msra.mxu1 %vm481_vm0, %v2094_v10  ;;  %v2167_v25 = vld [vmem:[%s2076_s21 + $0xb0] sm:$0xff]  ;;  %v2177_v27 = vld [vmem:[%s2076_s21 + $0xa8] sm:$0xff]  ;;  %v2187_v29 = vld [vmem:[%s2076_s21 + $0xa0] sm:$0xff] }
  0x20   : > { %1697 = vmatprep.subr.msk.mxu1 %vm481_vm0, %v2097_v11  ;;  %v2174_v26 = vld [vmem:[%s2076_s21 + $0x30] sm:$0xff]  ;;  %v2184_v28 = vld [vmem:[%s2076_s21 + $0x28] sm:$0xff]  ;;  %v2194_v30 = vld [vmem:[%s2076_s21 + $0x20] sm:$0xff] }
  0x21   : > { %v2197_v31 = vld [vmem:[%s2076_s21 + $0x98] sm:$0xff]  ;;  %v2207_v33 = vld [vmem:[%s2076_s21 + $0x90] sm:$0xff]  ;;  %v2217_v35 = vld [vmem:[%s2076_s21 + $0x88] sm:$0xff] }
  0x22   : > { %v2204_v32 = vld [vmem:[%s2076_s21 + $0x18] sm:$0xff]  ;;  %v2214_v34 = vld [vmem:[%s2076_s21 + $0x10] sm:$0xff]  ;;  %v2224_v36 = vld [vmem:[%s2076_s21 + $0x8] sm:$0xff] }
  0x23   : > { %1698 = vmatpush3.xpose.msk.msra.mxu1 %vm481_vm0, %v2104_v12  ;;  %v2227_v37 = vld [vmem:[%s2076_s21 + $0x80] sm:$0xff] }
  0x24   : > { %1699 = vmatprep.subr.msk.mxu1 %vm481_vm0, %v2107_v13  ;;  %v2234_v38 = vld [vmem:[%s2076_s21] sm:$0xff]  ;;  %s1547_s21 = sshll.u32 %s361_s19, 2 }
  0x25   : > { %v2243_v39 = vld [vmem:[%s2564_s1] ss:$0 sm:$0xff]  ;;  %s363_s22 = scalar_lea.vmem [#allocation3], %s1547_s21  ;;  %s1946_s21 = smov [#allocation3]  }
  0x26   : > { %v432_v40 = vsub.f32 %v2082_v7, %v2243_v39  ;;  %v447_v41 = vsub.f32 %v2085_v8, %v2243_v39  ;;  %v448_v42 = vsub.f32 %v2079_v6, %v2243_v39  ;;  %v431_v43 = vsub.f32 %v2094_v10, %v2243_v39  ;;  %s1459_s28 = sshll.u32 %s363_s22, 4  ;;  %s1884_s3 = sshll.u32 %s1946_s21, 4  ;;  %s1460_s28 = int_to_ptr.vmem [resolvable:$true] %s1459_s28  ;;  %s1885_s3 = int_to_ptr.vmem [resolvable:$false] %s1884_s3 }
  0x27   : > { %1700 = vmatpush3.xpose.msk.msra.mxu1 %vm481_vm0, %v2114_v14  ;;  %v446_v46 = vsub.f32 %v2097_v11, %v2243_v39  ;;  %v430_v49 = vsub.f32 %v2104_v12, %v2243_v39  ;;  %v445_v51 = vsub.f32 %v2107_v13, %v2243_v39  ;;  %v429_v53 = vsub.f32 %v2114_v14, %v2243_v39  ;;  %s1880_s14 = scalar_lea.vmem %s1460_s28, 64  ;;  %s1886_s13 = scalar_lea.vmem %s1885_s3, 128 }
  0x28   : > { %1701 = vmatprep.subr.msk.mxu1 %vm481_vm0, %v2117_v15  ;;  %v464_v44 = vmul.f32 %v432_v40, %v432_v40  ;;  %v479_v45 = vmul.f32 %v447_v41, %v447_v41  ;;  %v480_v47 = vmul.f32 %v448_v42, %v448_v42  ;;  %v463_v48 = vmul.f32 %v431_v43, %v431_v43  ;;  %p1881_p11 = scmp.ne.s32.totalorder %s1460_s28, %s1880_s14  ;;  %p1887_p0 = scmp.lt.s32.totalorder %s1460_s28, %s1885_s3 }
  0x29   : > { %v478_v50 = vmul.f32 %v446_v46, %v446_v46  ;;  %v462_v52 = vmul.f32 %v430_v49, %v430_v49  ;;  %v477_v54 = vmul.f32 %v445_v51, %v445_v51  ;;  %v444_v55 = vsub.f32 %v2117_v15, %v2243_v39  ;;  %p1888_p1 = scmp.lt.s32.totalorder %s1886_s13, %s1880_s14 }
  0x2a   : > { %1659 = vmatprep.subr.msk.mxu0 %vm481_vm0, %v480_v47  ;;  %v461_v56 = vmul.f32 %v429_v53, %v429_v53  ;;  %v428_v57 = vsub.f32 %v2124_v16, %v2243_v39  ;;  %v443_v59 = vsub.f32 %v2127_v17, %v2243_v39  ;;  %v427_v61 = vsub.f32 %v2134_v18, %v2243_v39  ;;  %p1882_p12 = pnand %p1881_p11, %p2043_p5 }
  0x2b   : > { %1702 = vmatpush3.xpose.msk.msra.mxu1 %vm481_vm0, %v2124_v16  ;;  %1660 = vmatpush3.xpose.msk.msra.mxu0 %vm481_vm0, %v464_v44  ;;  %v476_v58 = vmul.f32 %v444_v55, %v444_v55  ;;  %v442_v63 = vsub.f32 %v2137_v19, %v2243_v39  ;;  %v441_v4 = vsub.f32 %v2147_v21, %v2243_v39  ;;  %p1889_p2 = por %p1888_p1, %p1887_p0 }
  0x2c   : > { %1703 = vmatprep.subr.msk.mxu1 %vm481_vm0, %v2127_v17  ;;  %1661 = vmatprep.subr.msk.mxu0 %vm481_vm0, %v479_v45  ;;  %v460_v60 = vmul.f32 %v428_v57, %v428_v57  ;;  %v475_v62 = vmul.f32 %v443_v59, %v443_v59  ;;  %v459_v0 = vmul.f32 %v427_v61, %v427_v61  ;;  %p1883_p13 = pneg %p1882_p12 }
  0x2d   : > { %v474_v2 = vmul.f32 %v442_v63, %v442_v63  ;;  %v425_v9 = vsub.f32 %v2154_v22, %v2243_v39  ;;  %v473_v40 = vmul.f32 %v441_v4, %v441_v4  ;;  %v440_v41 = vsub.f32 %v2157_v23, %v2243_v39 }
  0x2e   : > { %v424_v43 = vsub.f32 %v2164_v24, %v2243_v39  ;;  %v439_v45 = vsub.f32 %v2167_v25, %v2243_v39  ;;  %v423_v47 = vsub.f32 %v2174_v26, %v2243_v39  ;;  %v438_v49 = vsub.f32 %v2177_v27, %v2243_v39  ;;  %p1890_p3 = pnand %p1889_p2, %p1883_p13 }
  0x2f   : > { %1704 = vmatpush3.xpose.msk.msra.mxu1 %vm481_vm0, %v2134_v18  ;;  %1662 = vmatpush3.xpose.msk.msra.mxu0 %vm481_vm0, %v463_v48  ;;  %v457_v42 = vmul.f32 %v425_v9, %v425_v9  ;;  %v472_v44 = vmul.f32 %v440_v41, %v440_v41  ;;  %v422_v51 = vsub.f32 %v2184_v28, %v2243_v39 }
  0x30   : > { %1705 = vmatprep.subr.msk.mxu1 %vm481_vm0, %v2137_v19  ;;  %1663 = vmatprep.subr.msk.mxu0 %vm481_vm0, %v478_v50  ;;  %v456_v46 = vmul.f32 %v424_v43, %v424_v43  ;;  %v471_v48 = vmul.f32 %v439_v45, %v439_v45  ;;  %v455_v50 = vmul.f32 %v423_v47, %v423_v47  ;;  %v660_v45 = vlaneseq }
  0x31   : > { %v437_v53 = vsub.f32 %v2187_v29, %v2243_v39  ;;  %v421_v55 = vsub.f32 %v2194_v30, %v2243_v39  ;;  %v436_v57 = vsub.f32 %v2197_v31, %v2243_v39  ;;  %v420_v59 = vsub.f32 %v2204_v32, %v2243_v39 }
  0x32   : > { %v435_v61 = vsub.f32 %v2207_v33, %v2243_v39  ;;  %v419_v63 = vsub.f32 %v2214_v34, %v2243_v39  ;;  %v434_v4 = vsub.f32 %v2217_v35, %v2243_v39  ;;  %v417_v47 = vsub.f32 %v2234_v38, %v2243_v39 }
  0x33   : > { %1706 = vmatpush3.xpose.msk.msra.mxu1 %vm481_vm0, %v2144_v20  ;;  %1664 = vmatpush3.xpose.msk.msra.mxu0 %vm481_vm0, %v462_v52  ;;  %v470_v52 = vmul.f32 %v438_v49, %v438_v49  ;;  %v2338_v49 = vshrl.u32 %v660_v45, 7  ;;  %vm2415_vm3 = vcmp.lt.s32.totalorder %v660_v45, 256 }
  0x34   : > { %1707 = vmatprep.subr.msk.mxu1 %vm481_vm0, %v2147_v21  ;;  %1665 = vmatprep.subr.msk.mxu0 %vm481_vm0, %v477_v54  ;;  %v454_v54 = vmul.f32 %v422_v51, %v422_v51  ;;  %v451_v41 = vmul.f32 %v419_v63, %v419_v63  ;;  %v466_v43 = vmul.f32 %v434_v4, %v434_v4 }
  0x35   : > { %v2343_v51 = vsub.s32 0, %v2338_v49 }
  0x37   : > { %1708 = vmatpush3.xpose.msk.msra.mxu1 %vm481_vm0, %v2154_v22  ;;  %1666 = vmatpush3.xpose.msk.msra.mxu0 %vm481_vm0, %v461_v56  ;;  %v469_v56 = vmul.f32 %v437_v53, %v437_v53 }
  0x38   : > { %1709 = vmatprep.subr.msk.mxu1 %vm481_vm0, %v2157_v23  ;;  %1667 = vmatprep.subr.msk.mxu0 %vm481_vm0, %v476_v58  ;;  %v453_v58 = vmul.f32 %v421_v55, %v421_v55 }
  0x3b   : > { %1710 = vmatpush3.xpose.msk.msra.mxu1 %vm481_vm0, %v2164_v24  ;;  %1668 = vmatpush3.xpose.msk.msra.mxu0 %vm481_vm0, %v460_v60  ;;  %v468_v60 = vmul.f32 %v436_v57, %v436_v57 }
  0x3c   : > { %1711 = vmatprep.subr.msk.mxu1 %vm481_vm0, %v2167_v25  ;;  %1669 = vmatprep.subr.msk.mxu0 %vm481_vm0, %v475_v62  ;;  %v452_v62 = vmul.f32 %v420_v59, %v420_v59 }
  0x3f   : > { %1712 = vmatpush3.xpose.msk.msra.mxu1 %vm481_vm0, %v2174_v26  ;;  %1670 = vmatpush3.xpose.msk.msra.mxu0 %vm481_vm0, %v459_v0 }
  0x40   : > { %1713 = vmatprep.subr.msk.mxu1 %vm481_vm0, %v2177_v27  ;;  %1671 = vmatprep.subr.msk.mxu0 %vm481_vm0, %v474_v2  ;;  %v467_v2 = vmul.f32 %v435_v61, %v435_v61 }
  0x43   : > { %1714 = vmatpush3.xpose.msk.msra.mxu1 %vm481_vm0, %v2184_v28 }
  0x44   : > { %1715 = vmatprep.subr.msk.mxu1 %vm481_vm0, %v2187_v29 }
  0x47   : > { %1716 = vmatpush3.xpose.msk.msra.mxu1 %vm481_vm0, %v2194_v30 }
  0x48   : > { %1717 = vmatprep.subr.msk.mxu1 %vm481_vm0, %v2197_v31 }
  0x4b   : > { %1718 = vmatpush3.xpose.msk.msra.mxu1 %vm481_vm0, %v2204_v32 }
  0x4c   : > { %1719 = vmatprep.subr.msk.mxu1 %vm481_vm0, %v2207_v33 }
  0x4f   : > { %1720 = vmatpush3.xpose.msk.msra.mxu1 %vm481_vm0, %v2214_v34 }
  0x50   : > { %1721 = vmatprep.subr.msk.mxu1 %vm481_vm0, %v2217_v35 }
  0x53   : > { %1722 = vmatpush3.xpose.msk.msra.mxu1 %vm481_vm0, %v2224_v36 }
  0x54   : > { %1723 = vmatprep.subr.msk.mxu1 %vm481_vm0, %v2227_v37 }
  0x57   : > { %1724 = vmatpush3.xpose.msk.msra.mxu1 %vm481_vm0, %v2234_v38 }
  0x5a   : > { %1726 = vmatmul.mubr.msk.f32.vlgmr.msra.gmra.mxu1 %vm481_vm0, %v2057_v1  ;;  %v426_v1 = vsub.f32 %v2144_v20, %v2243_v39 }
  0x5c   : > { %v458_v5 = vmul.f32 %v426_v1, %v426_v1 }
  0x5e   : > { %1672 = vmatpush3.xpose.msk.msra.mxu0 %vm481_vm0, %v458_v5 }
  0x5f   : > { %1673 = vmatprep.subr.msk.mxu0 %vm481_vm0, %v473_v40 }
  0x62   : > { %1674 = vmatpush3.xpose.msk.msra.mxu0 %vm481_vm0, %v457_v42  ;;  %v418_v42 = vsub.f32 %v2224_v36, %v2243_v39 }
  0x63   : > { %1675 = vmatprep.subr.msk.mxu0 %vm481_vm0, %v472_v44  ;;  %v433_v44 = vsub.f32 %v2227_v37, %v2243_v39 }
  0x66   : > { %1676 = vmatpush3.xpose.msk.msra.mxu0 %vm481_vm0, %v456_v46  ;;  %v450_v46 = vmul.f32 %v418_v42, %v418_v42 }
  0x67   : > { %1677 = vmatprep.subr.msk.mxu0 %vm481_vm0, %v471_v48  ;;  %v465_v48 = vmul.f32 %v433_v44, %v433_v44 }
  0x6a   : > { %1678 = vmatpush3.xpose.msk.msra.mxu0 %vm481_vm0, %v455_v50  ;;  %v449_v50 = vmul.f32 %v417_v47, %v417_v47 }
  0x6b   : > { %1679 = vmatprep.subr.msk.mxu0 %vm481_vm0, %v470_v52 }
  0x6e   : > { %1680 = vmatpush3.xpose.msk.msra.mxu0 %vm481_vm0, %v454_v54 }
  0x6f   : > { %1681 = vmatprep.subr.msk.mxu0 %vm481_vm0, %v469_v56 }
  0x72   : > { %1682 = vmatpush3.xpose.msk.msra.mxu0 %vm481_vm0, %v453_v58 }
  0x73   : > { %1683 = vmatprep.subr.msk.mxu0 %vm481_vm0, %v468_v60  ;;  %v873_v60 = vsub.s32 1, %v2338_v49 }
  0x76   : > { %1684 = vmatpush3.xpose.msk.msra.mxu0 %vm481_vm0, %v452_v62 }
  0x77   : > { %1685 = vmatprep.subr.msk.mxu0 %vm481_vm0, %v467_v2 }
  0x7a   : > { %1686 = vmatpush3.xpose.msk.msra.mxu0 %vm481_vm0, %v451_v41 }
  0x7b   : > { %1687 = vmatprep.subr.msk.mxu0 %vm481_vm0, %v466_v43 }
  0x7e   : > { %1688 = vmatpush3.xpose.msk.msra.mxu0 %vm481_vm0, %v450_v46 }
  0x7f   : > { %1689 = vmatprep.subr.msk.mxu0 %vm481_vm0, %v465_v48 }
  0x82   : > { %1690 = vmatpush3.xpose.msk.msra.mxu0 %vm481_vm0, %v449_v50 }
  0x93   : > { %v674_v0 = vpop.permute.xlu0 %673 }
  0x94   : > { %v869_v62 = vpop.permute.xlu1 %868 }
  0x97   : > { %v851_v54 = vpop.permute.xlu0 %850 }
  0x99   : > { %v887_v43 = vpop.permute.xlu1 %886 }
 0x11a   : > { %v841_v1 = vpop.f32.mrf.mxu1 }
 0x11b   : > { %v842_v5 = vadd.f32 %v841_v1, %v674_v0 }
 0x11c   : > { %v843_v9 = vpop.f32.mrf.mxu1 }
 0x11d   : > { %1860 = vtanh.f32 %v842_v5  ;;  %v844_v40 = vadd.f32 %v843_v9, %v674_v0 }
 0x11f   : > { %1862 = vtanh.f32 %v844_v40 }
 0x12a   : > { %v1861_v52 = vpop.eup %1860 }
 0x12b   : > { %v856_v39 = vrot.slane %v1861_v52, %v2343_v51 }
 0x12c   : > { %v1863_v53 = vpop.eup %1862 }
 0x12d   : > { %v861_v55 = vmul.f32 %v856_v39, %v851_v54  ;;  %v860_v56 = vrot.slane %v1863_v53, %v2343_v51  ;;  %v667_v53 = vld [vmem:[%s2568_s5] sm:$0xf] }
 0x12e   : > { %1760 = vmatprep.subr.msk.mxu0 %vm924_vm1, %v667_v53  ;;  %1810 = vmatprep.subr.msk.mxu1 %vm924_vm1, %v667_v53 }
 0x12f   : > { %v863_v57 = vadd.f32 %v861_v55, %v842_v5  ;;  %v862_v58 = vmul.f32 %v860_v56, %v851_v54  ;;  %v410_v5 = vld [vmem:[%s2565_s2] sm:$0x1]  ;;  %1811 = vmatpush3.msk.msra.mxu1 %vm924_vm1, %v667_v53 }
 0x130   : > { %1691 = vmatprep.mubr.msk.f32.mxu0 %vm481_vm0, %v410_v5  ;;  %v654_v56 = vld [vmem:[#allocation2] sm:$0x1] }
 0x131   : > { %1864 = vtanh.f32 %v863_v57  ;;  %v864_v59 = vadd.f32 %v862_v58, %v844_v40  ;;  %1692 = vmatmul.mubr.msk.f32.vlgmr.msra.gmra.mxu0 %vm481_vm0, %v410_v5  ;;  %v891_v40 = vsub.s32 2, %v2338_v49 }
 0x132   : > { %1761 = vmatpush3.msk.msra.mxu0 %vm924_vm1, %v667_v53 }
 0x133   : > { %1866 = vtanh.f32 %v864_v59 }
 0x13e   : > { %v1865_v61 = vpop.eup %1864 }
 0x13f   : > { %v874_v63 = vrot.slane %v1865_v61, %v873_v60 }
 0x140   : > { %v1867_v0 = vpop.eup %1866 }
 0x141   : > { %v878_v1 = vrot.slane %v1867_v0, %v873_v60  ;;  %v879_v2 = vmul.f32 %v874_v63, %v869_v62 }
 0x143   : > { %v880_v4 = vmul.f32 %v878_v1, %v869_v62  ;;  %v881_v9 = vadd.f32 %v879_v2, %v863_v57  ;;  %v669_v57 = vld [vmem:[%s2570_s7] sm:$0xf] }
 0x145   : > { %v882_v41 = vadd.f32 %v880_v4, %v864_v59  ;;  %1868 = vtanh.f32 %v881_v9 }
 0x147   : > { %1870 = vtanh.f32 %v882_v41 }
 0x152   : > { %v1869_v42 = vpop.eup %1868 }
 0x153   : > { %v892_v44 = vrot.slane %v1869_v42, %v891_v40 }
 0x154   : > { %v1871_v46 = vpop.eup %1870 }
 0x155   : > { %v896_v47 = vrot.slane %v1871_v46, %v891_v40  ;;  %v897_v48 = vmul.f32 %v892_v44, %v887_v43 }
 0x157   : > { %v898_v50 = vmul.f32 %v896_v47, %v887_v43  ;;  %v899_v52 = vadd.f32 %v897_v48, %v881_v9 }
 0x159   : > { %v900_v39 = vadd.f32 %v898_v50, %v882_v41  ;;  %1872 = vtanh.f32 %v899_v52 }
 0x15b   : > { %1874 = vtanh.f32 %v900_v39 }
 0x166   : > { %v2359_v54 = vpop.eup %1872 }
 0x167   : > { %982 = vxpose.xlu0.b32.start.end [1/1] (short) %v2359_v54, 128 }
 0x168   : > { %v2365_v55 = vpop.eup %1874 }
 0x169   : > { %1014 = vxpose.xlu1.b32.start.end [1/1] (short) %v2365_v55, 128 }
 0x187   : > { %1859 = vset.pattern.permute.xlu1 %v1942_v3 }
 0x1c3   : > { %657 = vperm.xlu1 %1859, %v654_v56  }
 0x1cc   : > { %909 = vperm.xlu0 %1856, %v669_v57  }
 0x1e3   : > { %v998_v58 = vpop.trf.xlu0 }
 0x1e4   : > { %1762 = vmatprep.mubr.msk.f32.mxu0 %vm1046_vm2, %v998_v58 }
 0x1e5   : > { %v1030_v59 = vpop.trf.xlu1 }
 0x1e6   : > { %1786 = vmatprep.mubr.msk.f32.mxu1 %vm1046_vm2, %v1030_v59 }
 0x1e7   : > { %v999_v60 = vpop.trf.xlu0 }
 0x1e8   : > { %1763 = vmatmul.mubr.msk.f32.vlgmr.msra.gmra.mxu0 %vm1046_vm2, %v999_v60 }
 0x1e9   : > { %v1031_v61 = vpop.trf.xlu1 }
 0x1ea   : > { %1787 = vmatmul.mubr.msk.f32.vlgmr.msra.gmra.mxu1 %vm1046_vm2, %v1031_v61 }
 0x1eb   : > { %v1000_v3 = vpop.trf.xlu0 }
 0x1ec   : > { %1765 = vmatprep.mubr.msk.f32.mxu0 %vm1046_vm2, %v1000_v3 }
 0x1ed   : > { %v1032_v62 = vpop.trf.xlu1 }
 0x1ee   : > { %1789 = vmatprep.mubr.msk.f32.mxu1 %vm1046_vm2, %v1032_v62 }
 0x1ef   : > { %v1001_v63 = vpop.trf.xlu0 }
 0x1f0   : > { %1766 = vmatmul.mubr.msk.f32.gmra.mxu0 %vm1046_vm2, %v1001_v63  ;;  %v1945_v63 = vmov 1966171168  }
 0x1f1   : > { %v1033_v0 = vpop.trf.xlu1  ;;  %v647_v62 = vpop.f32.mrf.mxu0 }
 0x1f2   : > { %1790 = vmatmul.mubr.msk.f32.gmra.mxu1 %vm1046_vm2, %v1033_v0  ;;  %v943_v0 = vunpack.c.l.s4 %v1945_v63 }
 0x1f3   : > { %v1002_v1 = vpop.trf.xlu0 }
 0x1f4   : > { %1768 = vmatprep.mubr.msk.f32.mxu0 %vm1046_vm2, %v1002_v1  ;;  %v649_v1 = vpop.f32.mrf.mxu0 }
 0x1f5   : > { %v1034_v2 = vpop.trf.xlu1 }
 0x1f6   : > { %1792 = vmatprep.mubr.msk.f32.mxu1 %vm1046_vm2, %v1034_v2  ;;  %v904_v2 = vmul.f32 %v2365_v55, %v2365_v55 }
 0x1f7   : > { %v1003_v4 = vpop.trf.xlu0 }
 0x1f8   : > { %1769 = vmatmul.mubr.msk.f32.gmra.mxu0 %vm1046_vm2, %v1003_v4  ;;  %v903_v4 = vmul.f32 %v2359_v54, %v2359_v54 }
 0x1f9   : > { %v1035_v9 = vpop.trf.xlu1 }
 0x1fa   : > { %1793 = vmatmul.mubr.msk.f32.gmra.mxu1 %vm1046_vm2, %v1035_v9  ;;  %v652_v9 = vmul.f32 -0.5, %v647_v62 }
 0x1fb   : > { %v1004_v41 = vpop.trf.xlu0 }
 0x1fc   : > { %1771 = vmatprep.mubr.msk.f32.mxu0 %vm1046_vm2, %v1004_v41  ;;  %v653_v41 = vmul.f32 -0.5, %v649_v1 }
 0x1fd   : > { %v1036_v5 = vpop.trf.xlu1 }
 0x1fe   : > { %1795 = vmatprep.mubr.msk.f32.mxu1 %vm1046_vm2, %v1036_v5 }
 0x1ff   : > { %v1005_v40 = vpop.trf.xlu0 }
 0x200   : > { %1772 = vmatmul.mubr.msk.f32.gmra.mxu0 %vm1046_vm2, %v1005_v40  ;;  %v944_v40 = vunpack.c.0.s8 %v943_v0 }
 0x201   : > { %v1037_v42 = vpop.trf.xlu1 }
 0x202   : > { %1796 = vmatmul.mubr.msk.f32.gmra.mxu1 %vm1046_vm2, %v1037_v42  ;;  %v947_v55 = vsub.s32 %v944_v40, %v2338_v49 }
 0x203   : > { %v1006_v43 = vpop.trf.xlu0 }
 0x204   : > { %1774 = vmatprep.mubr.msk.f32.mxu0 %vm1046_vm2, %v1006_v43  ;;  %v906_v43 = vsub.f32 1.0, %v904_v2 }
 0x205   : > { %v1038_v44 = vpop.trf.xlu1 }
 0x206   : > { %1798 = vmatprep.mubr.msk.f32.mxu1 %vm1046_vm2, %v1038_v44  ;;  %v905_v44 = vsub.f32 1.0, %v903_v4 }
 0x207   : > { %v1007_v46 = vpop.trf.xlu0 }
 0x208   : > { %1775 = vmatmul.mubr.msk.f32.gmra.mxu0 %vm1046_vm2, %v1007_v46 }
 0x209   : > { %v1039_v47 = vpop.trf.xlu1 }
 0x20a   : > { %1799 = vmatmul.mubr.msk.f32.gmra.mxu1 %vm1046_vm2, %v1039_v47 }
 0x20b   : > { %v1008_v48 = vpop.trf.xlu0 }
 0x20c   : > { %1777 = vmatprep.mubr.msk.f32.mxu0 %vm1046_vm2, %v1008_v48 }
 0x20d   : > { %v1040_v50 = vpop.trf.xlu1 }
 0x20e   : > { %1801 = vmatprep.mubr.msk.f32.mxu1 %vm1046_vm2, %v1040_v50 }
 0x20f   : > { %v1009_v52 = vpop.trf.xlu0 }
 0x210   : > { %1778 = vmatmul.mubr.msk.f32.gmra.mxu0 %vm1046_vm2, %v1009_v52 }
 0x211   : > { %v1041_v39 = vpop.trf.xlu1 }
 0x212   : > { %1802 = vmatmul.mubr.msk.f32.gmra.mxu1 %vm1046_vm2, %v1041_v39 }
 0x213   : > { %v1010_v53 = vpop.trf.xlu0 }
 0x214   : > { %1780 = vmatprep.mubr.msk.f32.mxu0 %vm1046_vm2, %v1010_v53 }
 0x215   : > { %v1042_v56 = vpop.trf.xlu1 }
 0x216   : > { %1804 = vmatprep.mubr.msk.f32.mxu1 %vm1046_vm2, %v1042_v56 }
 0x217   : > { %v1011_v57 = vpop.trf.xlu0 }
 0x218   : > { %1781 = vmatmul.mubr.msk.f32.gmra.mxu0 %vm1046_vm2, %v1011_v57 }
 0x219   : > { %v1043_v58 = vpop.trf.xlu1 }
 0x21a   : > { %1805 = vmatmul.mubr.msk.f32.gmra.mxu1 %vm1046_vm2, %v1043_v58 }
 0x21b   : > { %v1012_v59 = vpop.trf.xlu0 }
 0x21c   : > { %1783 = vmatprep.mubr.msk.f32.mxu0 %vm1046_vm2, %v1012_v59 }
 0x21d   : > { %v1044_v60 = vpop.trf.xlu1 }
 0x21e   : > { %1807 = vmatprep.mubr.msk.f32.mxu1 %vm1046_vm2, %v1044_v60 }
 0x21f   : > { %v1013_v61 = vpop.trf.xlu0 }
 0x220   : > { %1784 = vmatmul.mubr.msk.f32.gmra.mxu0 %vm1046_vm2, %v1013_v61 }
 0x221   : > { %v1045_v3 = vpop.trf.xlu1 }
 0x222   : > { %1808 = vmatmul.mubr.msk.f32.gmra.mxu1 %vm1046_vm2, %v1045_v3 }
 0x23e   : > { %v658_v5 = vpop.permute.xlu1 %657 }
 0x23f   : > { %v663_v42 = vrot.slane %v658_v5, %v2343_v51 }
 0x241   : > { %v664_v46 = vadd.f32 %v663_v42, %v652_v9  ;;  %v665_v47 = vadd.f32 %v663_v42, %v653_v41 }
 0x243   : > { %v941_v39 = vcombine.low %v664_v46, %v665_v47 }
 0x245   : > { %v948_v56 = vrot.slane %v941_v39, %v947_v55 }
 0x247   : > { %v910_v48 = vpop.permute.xlu0 %909  ;;  %v955_v59 = vrot.slane %v948_v56, %v947_v55 }
 0x248   : > { %v912_v50 = vmul.f32 %v910_v48, %v905_v44  ;;  %v913_v52 = vmul.f32 %v910_v48, %v906_v43 }
 0x249   : > { %961 = vst.msk [vmem:[%s363_s22] ss:$2 sm:$0x3] %vm2415_vm3, %v955_v59 }
 0x24a   : > { %v914_v53 = vadd.f32 1.0, %v912_v50  ;;  %v915_v54 = vadd.f32 1.0, %v913_v52 }
 0x24c   : > { %v916_v57 = vand.u32 2147483647, %v914_v53  ;;  %v917_v58 = vand.u32 2147483647, %v915_v54 }
 0x24e   : > { %v918_v60 = vadd.f32 1e-07, %v916_v57  ;;  %v919_v61 = vadd.f32 1e-07, %v917_v58 }
 0x250   : > { %1876 = vlog2.f32 %v918_v60 }
 0x251   : > { %1878 = vlog2.f32 %v919_v61 }
 0x25d   : > { %v1877_v49 = vpop.eup %1876 }
 0x25e   : > { %v1879_v3 = vpop.eup %1878  ;;  %v921_v62 = vmul.f32 0.6931472, %v1877_v49 }
 0x25f   : > { %v923_v63 = vmul.f32 0.6931472, %v1879_v3 }
 0x260   : > { %v925_v0 = vsel %vm924_vm1, %v921_v62, 0.0 }
 0x261   : > { %v926_v1 = vrot.slane %v925_v0, 4  ;;  %v932_v45 = vsel %vm924_vm1, %v923_v63, 0.0 }
 0x262   : > { %v933_v2 = vrot.slane %v932_v45, 4 }
 0x263   : > { %v927_v4 = vadd.f32 %v926_v1, %v925_v0 }
 0x264   : > { %v934_v9 = vadd.f32 %v933_v2, %v932_v45 }
 0x265   : > { %v928_v41 = vrot.slane %v927_v4, 2 }
 0x266   : > { %v935_v5 = vrot.slane %v934_v9, 2 }
 0x267   : > { %v929_v40 = vadd.f32 %v928_v41, %v927_v4 }
 0x268   : > { %v936_v42 = vadd.f32 %v935_v5, %v934_v9 }
 0x269   : > { %v930_v43 = vrot.slane %v929_v40, 1 }
 0x26a   : > { %v937_v44 = vrot.slane %v936_v42, 1 }
 0x26b   : > { %v931_v46 = vadd.f32 %v930_v43, %v929_v40 }
 0x26c   : > { %v938_v47 = vadd.f32 %v937_v44, %v936_v42 }
 0x26e   : > { %v964_v48 = vcombine.low %v931_v46, %v938_v47 }
 0x270   : > { %v971_v50 = vrot.slane %v964_v48, %v947_v55 }
 0x272   : > { %v978_v52 = vrot.slane %v971_v50, %v947_v55 }
 0x274   : > { %1619 = vst.msk [vmem:[%s363_s22 + $0x1] ss:$2 sm:$0x3] %vm2415_vm3, %v978_v52 }
 0x275   : > { %1893 = shalt.err (!%p1890_p3)
}
 0x276   : > { %s1894_s27 = scalar_lea.hbm %s1457_s11, 64  ;;  %s1898_s29 = scalar_lea.hbm %s2573_s10, 128 }
 0x277   : > { %p1895_p4 = scmp.ne.s32.totalorder %s1457_s11, %s1894_s27  ;;  %p1899_p9 = scmp.lt.s32.totalorder %s1457_s11, %s2573_s10 }
 0x278   : > { %p1900_p10 = scmp.lt.s32.totalorder %s1898_s29, %s1894_s27 }
 0x279   : > { %p1896_p7 = pnand %p1895_p4, %p2043_p5 }
 0x27a   : > { %p1901_p11 = por %p1900_p10, %p1899_p9 }
 0x27b   : > { %p1897_p8 = pneg %p1896_p7 }
 0x27d   : > { %p1902_p12 = pnand %p1901_p11, %p1897_p8 }
 0x27f   : > { %1905 = shalt.err (!%p1902_p12)
}
 0x280   : > { %1812 = dma.vmem_to_hbm [thread:$0]  (%p2043_p5), %s1460_s28, 64, %s1457_s11, %s1441_s12  }
 0x281   : > { %s2581_s13 = sshll.u32 %s2587_s26, 3 }
 0x282   : > { %s2448_s3 = scalar_lea.vmem %s2572_s9, %s2581_s13 }
 0x2a8   : > { %v1764_v55 = vpop.f32.mrf.mxu0 }
 0x2a9   : > { %v1372_v39 = vadd.f32 %v1764_v55, %v2224_v36 }
 0x2aa   : > { %v1212_v53 = vpop.f32.mrf.mxu0  ;;  %v1788_v54 = vpop.f32.mrf.mxu1 }
 0x2ab   : > { %1404 = vst.msk [vmem:[%s2448_s3 + $0x8] sm:$0xff] %vm481_vm0, %v1372_v39  ;;  %v1371_v56 = vadd.f32 %v1212_v53, %v2234_v38  ;;  %v1388_v57 = vadd.f32 %v1788_v54, %v2217_v35 }
 0x2ac   : > { %v1292_v58 = vpop.f32.mrf.mxu1 }
 0x2ad   : > { %1403 = vst.msk [vmem:[%s2448_s3] sm:$0xff] %vm481_vm0, %v1371_v56  ;;  %1420 = vst.msk [vmem:[%s2448_s3 + $0x88] sm:$0xff] %vm481_vm0, %v1388_v57  ;;  %v1387_v59 = vadd.f32 %v1292_v58, %v2227_v37 }
 0x2af   : > { %1419 = vst.msk [vmem:[%s2448_s3 + $0x80] sm:$0xff] %vm481_vm0, %v1387_v59 }
 0x2b0   : > { %v1767_v36 = vpop.f32.mrf.mxu0 }
 0x2b1   : > { %v1374_v51 = vadd.f32 %v1767_v36, %v2204_v32 }
 0x2b2   : > { %v1222_v60 = vpop.f32.mrf.mxu0  ;;  %v1791_v61 = vpop.f32.mrf.mxu1 }
 0x2b3   : > { %1406 = vst.msk [vmem:[%s2448_s3 + $0x18] sm:$0xff] %vm481_vm0, %v1374_v51  ;;  %v1373_v35 = vadd.f32 %v1222_v60, %v2214_v34  ;;  %v1390_v38 = vadd.f32 %v1791_v61, %v2197_v31 }
 0x2b4   : > { %v1302_v49 = vpop.f32.mrf.mxu1 }
 0x2b5   : > { %1405 = vst.msk [vmem:[%s2448_s3 + $0x10] sm:$0xff] %vm481_vm0, %v1373_v35  ;;  %1422 = vst.msk [vmem:[%s2448_s3 + $0x98] sm:$0xff] %vm481_vm0, %v1390_v38  ;;  %v1389_v37 = vadd.f32 %v1302_v49, %v2207_v33 }
 0x2b7   : > { %1421 = vst.msk [vmem:[%s2448_s3 + $0x90] sm:$0xff] %vm481_vm0, %v1389_v37 }
 0x2b8   : > { %v1770_v32 = vpop.f32.mrf.mxu0 }
 0x2b9   : > { %v1376_v3 = vadd.f32 %v1770_v32, %v2184_v28 }
 0x2ba   : > { %v1232_v62 = vpop.f32.mrf.mxu0  ;;  %v1794_v63 = vpop.f32.mrf.mxu1 }
 0x2bb   : > { %1408 = vst.msk [vmem:[%s2448_s3 + $0x28] sm:$0xff] %vm481_vm0, %v1376_v3  ;;  %v1375_v31 = vadd.f32 %v1232_v62, %v2194_v30  ;;  %v1392_v34 = vadd.f32 %v1794_v63, %v2177_v27 }
 0x2bc   : > { %v1312_v0 = vpop.f32.mrf.mxu1 }
 0x2bd   : > { %1407 = vst.msk [vmem:[%s2448_s3 + $0x20] sm:$0xff] %vm481_vm0, %v1375_v31  ;;  %1424 = vst.msk [vmem:[%s2448_s3 + $0xa8] sm:$0xff] %vm481_vm0, %v1392_v34  ;;  %v1391_v33 = vadd.f32 %v1312_v0, %v2187_v29 }
 0x2bf   : > { %1423 = vst.msk [vmem:[%s2448_s3 + $0xa0] sm:$0xff] %vm481_vm0, %v1391_v33 }
 0x2c0   : > { %v1773_v28 = vpop.f32.mrf.mxu0 }
 0x2c1   : > { %v1378_v1 = vadd.f32 %v1773_v28, %v2164_v24 }
 0x2c2   : > { %v1797_v45 = vpop.f32.mrf.mxu1  ;;  %v1242_v2 = vpop.f32.mrf.mxu0 }
 0x2c3   : > { %1410 = vst.msk [vmem:[%s2448_s3 + $0x38] sm:$0xff] %vm481_vm0, %v1378_v1  ;;  %v1394_v27 = vadd.f32 %v1797_v45, %v2157_v23  ;;  %v1377_v30 = vadd.f32 %v1242_v2, %v2174_v26 }
 0x2c4   : > { %v1322_v4 = vpop.f32.mrf.mxu1 }
 0x2c5   : > { %1426 = vst.msk [vmem:[%s2448_s3 + $0xb8] sm:$0xff] %vm481_vm0, %v1394_v27  ;;  %1409 = vst.msk [vmem:[%s2448_s3 + $0x30] sm:$0xff] %vm481_vm0, %v1377_v30  ;;  %v1393_v29 = vadd.f32 %v1322_v4, %v2167_v25 }
 0x2c7   : > { %1425 = vst.msk [vmem:[%s2448_s3 + $0xb0] sm:$0xff] %vm481_vm0, %v1393_v29 }
 0x2c8   : > { %v1776_v24 = vpop.f32.mrf.mxu0 }
 0x2c9   : > { %v1380_v9 = vadd.f32 %v1776_v24, %v2144_v20 }
 0x2ca   : > { %v1252_v41 = vpop.f32.mrf.mxu0  ;;  %v1800_v5 = vpop.f32.mrf.mxu1 }
 0x2cb   : > { %1412 = vst.msk [vmem:[%s2448_s3 + $0x48] sm:$0xff] %vm481_vm0, %v1380_v9  ;;  %v1379_v23 = vadd.f32 %v1252_v41, %v2154_v22  ;;  %v1396_v26 = vadd.f32 %v1800_v5, %v2137_v19 }
 0x2cc   : > { %v1332_v40 = vpop.f32.mrf.mxu1 }
 0x2cd   : > { %1411 = vst.msk [vmem:[%s2448_s3 + $0x40] sm:$0xff] %vm481_vm0, %v1379_v23  ;;  %1428 = vst.msk [vmem:[%s2448_s3 + $0xc8] sm:$0xff] %vm481_vm0, %v1396_v26  ;;  %v1395_v25 = vadd.f32 %v1332_v40, %v2147_v21 }
 0x2cf   : > { %1427 = vst.msk [vmem:[%s2448_s3 + $0xc0] sm:$0xff] %vm481_vm0, %v1395_v25 }
 0x2d0   : > { %v1779_v20 = vpop.f32.mrf.mxu0 }
 0x2d1   : > { %v1382_v42 = vadd.f32 %v1779_v20, %v2124_v16 }
 0x2d2   : > { %v1262_v43 = vpop.f32.mrf.mxu0  ;;  %v1803_v44 = vpop.f32.mrf.mxu1 }
 0x2d3   : > { %1414 = vst.msk [vmem:[%s2448_s3 + $0x58] sm:$0xff] %vm481_vm0, %v1382_v42  ;;  %v1381_v19 = vadd.f32 %v1262_v43, %v2134_v18  ;;  %v1398_v22 = vadd.f32 %v1803_v44, %v2117_v15 }
 0x2d4   : > { %v1342_v46 = vpop.f32.mrf.mxu1 }
 0x2d5   : > { %1413 = vst.msk [vmem:[%s2448_s3 + $0x50] sm:$0xff] %vm481_vm0, %v1381_v19  ;;  %1430 = vst.msk [vmem:[%s2448_s3 + $0xd8] sm:$0xff] %vm481_vm0, %v1398_v22  ;;  %v1397_v21 = vadd.f32 %v1342_v46, %v2127_v17 }
 0x2d7   : > { %1429 = vst.msk [vmem:[%s2448_s3 + $0xd0] sm:$0xff] %vm481_vm0, %v1397_v21 }
 0x2d8   : > { %v1782_v16 = vpop.f32.mrf.mxu0 }
 0x2d9   : > { %v1384_v47 = vadd.f32 %v1782_v16, %v2104_v12 }
 0x2da   : > { %v1272_v48 = vpop.f32.mrf.mxu0  ;;  %v1806_v50 = vpop.f32.mrf.mxu1 }
 0x2db   : > { %1416 = vst.msk [vmem:[%s2448_s3 + $0x68] sm:$0xff] %vm481_vm0, %v1384_v47  ;;  %v1383_v15 = vadd.f32 %v1272_v48, %v2114_v14  ;;  %v1400_v18 = vadd.f32 %v1806_v50, %v2097_v11 }
 0x2dc   : > { %v1352_v52 = vpop.f32.mrf.mxu1 }
 0x2dd   : > { %1415 = vst.msk [vmem:[%s2448_s3 + $0x60] sm:$0xff] %vm481_vm0, %v1383_v15  ;;  %1432 = vst.msk [vmem:[%s2448_s3 + $0xe8] sm:$0xff] %vm481_vm0, %v1400_v18  ;;  %v1399_v17 = vadd.f32 %v1352_v52, %v2107_v13 }
 0x2df   : > { %1431 = vst.msk [vmem:[%s2448_s3 + $0xe0] sm:$0xff] %vm481_vm0, %v1399_v17 }
 0x2e0   : > { %v1785_v12 = vpop.f32.mrf.mxu0 }
 0x2e1   : > { %v1386_v55 = vadd.f32 %v1785_v12, %v2082_v7 }
 0x2e2   : > { %v1282_v39 = vpop.f32.mrf.mxu0  ;;  %v1809_v53 = vpop.f32.mrf.mxu1 }
 0x2e3   : > { %1418 = vst.msk [vmem:[%s2448_s3 + $0x78] sm:$0xff] %vm481_vm0, %v1386_v55  ;;  %v1385_v14 = vadd.f32 %v1282_v39, %v2094_v10  ;;  %v1402_v11 = vadd.f32 %v1809_v53, %v2079_v6 }
 0x2e4   : > { %v1362_v54 = vpop.f32.mrf.mxu1 }
 0x2e5   : > { %1417 = vst.msk [vmem:[%s2448_s3 + $0x70] sm:$0xff] %vm481_vm0, %v1385_v14  ;;  %1434 = vst.msk [vmem:[%s2448_s3 + $0xf8] sm:$0xff] %vm481_vm0, %v1402_v11  ;;  %v1401_v13 = vadd.f32 %v1362_v54, %v2085_v8 }
 0x2e7   : > { %1433 = vst.msk [vmem:[%s2448_s3 + $0xf0] sm:$0xff] %vm481_vm0, %v1401_v13 }
 0x2e8 PF: > { %p1818_p5 = scmp.ge.s32.totalorder %s1940_s18, 2  ;;  %s1479_s0 = sand.u32 1, %s1928_s15  }
 0x2e9   : > { %s1480_s24 = scalar_lea.sflag [#allocation4], %s1479_s0 }
 0x2ea   : > { %p1815_p13 = pnand %p1818_p5, %p2047_p6 }
 0x2ec   : > { %p1816_p0 = pneg %p1815_p13 }
 0x2ee   : > { %1923 = dma.done.wait (%p1816_p0), %s1480_s24, 64  }
 0x2ef   : > { %1925 = vsyncadd (%p1816_p0), %s1480_s24, 4294967232  ;;  %p23_p1 = scmp.ge.s32.totalorder %s2030_s20, 4   ;;  %s2582_s15 = smov %s1932_s16 }
 0x2f0   : > { %s2583_s16 = smov %s1936_s17  ;;  %s2584_s17 = smov %s2041_s23 }
 0x2f1   : > { %s2585_s18 = smov %s2030_s20  ;;  %25 = sbr.rel (!%p23_p1) target bundleno = 6 (0x6), region = 104 }
 0x2f6   :  { %1485 = vsyncpa [#allocation4], 1 }
 0x2f7   :  { %1487 = vsyncpa [#allocation4 + $0x1], 1 }

</bundles_post_ra>
